<compile_context>
chip_gen: v5e
topology: v5e:2x2
jax: 0.10.0
libtpu: 0.0.40
codegen_flags: <defaults>
</compile_context>

<pallas_src>
import jax
import jax.numpy as jnp
from jax.experimental import pallas as pl
from jax.experimental.pallas import tpu as pltpu

BN_EPS = 1e-5


def pos_embed_kernel(x_ref, w1t_ref, scale_ref, shift_ref, w2t_ref, b2_ref, o_ref):
    """One (batch, n-tile) grid step.

    x_ref:     (TILE_N, C)  input positions, channels minor
    w1t_ref:   (F, C)       conv1 weight, channel-major
    scale_ref: (F, 1)       gamma / sqrt(var_h + eps)
    shift_ref: (F, 1)       (conv1_bias - mean_h) * scale + beta
    w2t_ref:   (F, F)       conv2 weight, channel-major
    b2_ref:    (F, 1)       conv2 bias
    o_ref:     (F, TILE_N)  output tile, lane-dense (N on lanes)
    """
    x = x_ref[...]                                        # (TILE_N, C)

    # conv1 (k=1): h[f, n] = sum_c w1[c, f] * x[n, c].  A @ B^T contraction
    # keeps the result channel-major with no transpose.  C is tiny so this
    # underfills the MXU, but it is negligible and the kernel is memory-bound.
    h = jax.lax.dot_general(
        w1t_ref[...], x,
        dimension_numbers=(((1,), (1,)), ((), ())),
        preferred_element_type=jnp.float32)               # (F, TILE_N)

    # BatchNorm1d (training-mode global batch stats folded into scale/shift,
    # conv1 bias folded into shift) + ReLU.
    h = jnp.maximum(h * scale_ref[...] + shift_ref[...], 0.0)

    # conv2 (k=1): (F, F) @ (F, TILE_N) + bias.
    out = jnp.dot(w2t_ref[...], h, preferred_element_type=jnp.float32)
    out = out + b2_ref[...]

    o_ref[...] = out.astype(o_ref.dtype)


def _pick_tile_n(n):
    """Largest multiple of 128 (<= 1024) that divides n; else n itself."""
    for t in range(1024, 0, -128):
        if n % t == 0:
            return t
    return n


def position_embedding_learned(xyz, params):
    """xyz: (B, N, C_in) float32 -> (B, num_pos_feats, N) float32."""
    B, N, C = xyz.shape
    F = params["w1"].shape[1]

    x = xyz.astype(jnp.float32)
    w1, b1 = params["w1"], params["b1"]            # (C, F), (1, F)
    gamma, beta = params["gamma"], params["beta"]  # (1, F), (1, F)
    w2, b2 = params["w2"], params["b2"]            # (F, F), (1, F)

    # ---- global training-mode BN statistics via input moments (cheap) ----
    # h = x @ w1 + b1 over M = B*N positions; mean/var of h per channel follow
    # exactly from the C-vector mean and CxC (biased) covariance of x.
    m = B * N
    x2d = x.reshape(m, C)
    mean_x = jnp.mean(x2d, axis=0, keepdims=True)                 # (1, C)
    xc = x2d - mean_x
    cov_x = xc.T @ xc / m                                         # (C, C)
    mean_h = mean_x @ w1 + b1                                     # (1, F)
    var_h = jnp.sum(w1 * (cov_x @ w1), axis=0, keepdims=True)     # (1, F)
    inv_std = jax.lax.rsqrt(var_h + BN_EPS)

    scale = gamma * inv_std                                       # (1, F)
    shift = (b1 - mean_h) * scale + beta                          # (1, F)

    # Channel-major copies of the tiny parameter tensors for the kernel.
    w1t = jnp.transpose(w1)          # (F, C)
    w2t = jnp.transpose(w2)          # (F, F)
    scale_c = jnp.transpose(scale)   # (F, 1)
    shift_c = jnp.transpose(shift)   # (F, 1)
    b2_c = jnp.transpose(b2)         # (F, 1)

    tile_n = _pick_tile_n(N)
    grid = (B, N // tile_n)

    return pl.pallas_call(
        pos_embed_kernel,
        out_shape=jax.ShapeDtypeStruct((B, F, N), jnp.float32),
        grid=grid,
        in_specs=[
            pl.BlockSpec((None, tile_n, C), lambda b, n: (b, n, 0)),  # x
            pl.BlockSpec((F, C), lambda b, n: (0, 0)),                # w1t
            pl.BlockSpec((F, 1), lambda b, n: (0, 0)),                # scale
            pl.BlockSpec((F, 1), lambda b, n: (0, 0)),                # shift
            pl.BlockSpec((F, F), lambda b, n: (0, 0)),                # w2t
            pl.BlockSpec((F, 1), lambda b, n: (0, 0)),                # b2
        ],
        out_specs=pl.BlockSpec((None, F, tile_n), lambda b, n: (b, 0, n)),
        compiler_params=pltpu.CompilerParams(
            dimension_semantics=("parallel", "parallel"),
            vmem_limit_bytes=48 * 1024 * 1024),
    )(x, w1t, scale_c, shift_c, w2t, b2_c)


def init_params(key, input_channel, num_pos_feats):
    """Deterministic synthetic parameters matching the module's shapes.

    PyTorch shapes: conv1.weight (F, C, 1), conv1.bias (F,),
                    bn.weight/bias (F,), conv2.weight (F, F, 1), conv2.bias (F,)
    Stored here pre-transposed for right-multiplication ((C,F)/(F,F) etc.).
    """
    k1, k2, k3, k4, k5, k6 = jax.random.split(key, 6)
    C, F = input_channel, num_pos_feats
    return {
        "w1": 0.1 * jax.random.normal(k1, (C, F), jnp.float32),
        "b1": 0.1 * jax.random.normal(k2, (1, F), jnp.float32),
        "gamma": 1.0 + 0.05 * jax.random.normal(k3, (1, F), jnp.float32),
        "beta": 0.05 * jax.random.normal(k4, (1, F), jnp.float32),
        "w2": 0.1 * jax.random.normal(k5, (F, F), jnp.float32),
        "b2": 0.1 * jax.random.normal(k6, (1, F), jnp.float32),
    }


def _reference(xyz, params):
    """Plain-JAX reference: conv1 -> training-mode BN (direct batch stats)
    -> ReLU -> conv2, matching the PyTorch module's forward."""
    B, N, C = xyz.shape
    F = params["w1"].shape[1]
    x2d = xyz.reshape(B * N, C).astype(jnp.float32)
    h = x2d @ params["w1"] + params["b1"]
    mean = jnp.mean(h, axis=0, keepdims=True)
    var = jnp.mean((h - mean) ** 2, axis=0, keepdims=True)
    hn = (h - mean) * jax.lax.rsqrt(var + BN_EPS) * params["gamma"] + params["beta"]
    hr = jnp.maximum(hn, 0.0)
    out = hr @ params["w2"] + params["b2"]
    return out.reshape(B, N, F).transpose(0, 2, 1)


if __name__ == "__main__":
    B, N, C_IN, NUM_POS_FEATS = 2, 16, 4, 32

    key = jax.random.PRNGKey(0)
    k_x, k_p = jax.random.split(key)
    xyz = jax.random.normal(k_x, (B, N, C_IN), jnp.float32)
    params = init_params(k_p, C_IN, NUM_POS_FEATS)

    out = jax.block_until_ready(position_embedding_learned(xyz, params))
    assert out.shape == (B, NUM_POS_FEATS, N), out.shape

    ref = _reference(xyz, params)
    err = float(jnp.max(jnp.abs(out - ref)))
    assert err < 1e-3, f"max abs err {err}"

    print("KERNEL_OK")
</pallas_src>

<mosaic_0001>
module attributes {stable_mosaic.version = 11 : i64} {
  func.func @pos_embed_kernel(%arg0: i32, %arg1: i32, %arg2: memref<1x16x4xf32, #tpu.memory_space<vmem>>, %arg3: memref<32x4xf32, #tpu.memory_space<vmem>>, %arg4: memref<32x1xf32, #tpu.memory_space<vmem>>, %arg5: memref<32x1xf32, #tpu.memory_space<vmem>>, %arg6: memref<32x32xf32, #tpu.memory_space<vmem>>, %arg7: memref<32x1xf32, #tpu.memory_space<vmem>>, %arg8: memref<1x32x16xf32, #tpu.memory_space<vmem>>) attributes {dimension_semantics = [#tpu.dimension_semantics<parallel>, #tpu.dimension_semantics<parallel>], iteration_bounds = array<i64: 2, 1>, scalar_prefetch = 0 : i64, scratch_operands = 0 : i64, tpu.core_type = #tpu.core_type<tc>, window_params = [{transform_indices = @transform_0, window_bounds = array<i64: 1, 16, 4>}, {pipeline_mode = #tpu.pipeline_mode<synchronous>, transform_indices = @transform_1, window_bounds = array<i64: 32, 4>}, {pipeline_mode = #tpu.pipeline_mode<synchronous>, transform_indices = @transform_2, window_bounds = array<i64: 32, 1>}, {pipeline_mode = #tpu.pipeline_mode<synchronous>, transform_indices = @transform_3, window_bounds = array<i64: 32, 1>}, {pipeline_mode = #tpu.pipeline_mode<synchronous>, transform_indices = @transform_4, window_bounds = array<i64: 32, 32>}, {pipeline_mode = #tpu.pipeline_mode<synchronous>, transform_indices = @transform_5, window_bounds = array<i64: 32, 1>}, {transform_indices = @transform_6, window_bounds = array<i64: 1, 32, 16>}]} {
    %c0 = arith.constant 0 : index
    %c0_0 = arith.constant 0 : index
    %c0_1 = arith.constant 0 : index
    %0 = vector.load %arg2[%c0, %c0_0, %c0_1] : memref<1x16x4xf32, #tpu.memory_space<vmem>>, vector<1x16x4xf32>
    %1 = vector.shape_cast %0 : vector<1x16x4xf32> to vector<16x4xf32>
    %c0_2 = arith.constant 0 : index
    %c0_3 = arith.constant 0 : index
    %2 = vector.load %arg3[%c0_2, %c0_3] : memref<32x4xf32, #tpu.memory_space<vmem>>, vector<32x4xf32>
    %cst = arith.constant dense<0.000000e+00> : vector<32x16xf32>
    %3 = tpu.matmul %2, %1, %cst {dimension_numbers = #tpu.dot_dimension_numbers<[1], [1], [0], [0], [0, 0, 1, 0], [], []>} : vector<32x4xf32>, vector<16x4xf32>, vector<32x16xf32> -> vector<32x16xf32>
    %c0_4 = arith.constant 0 : index
    %c0_5 = arith.constant 0 : index
    %4 = vector.load %arg4[%c0_4, %c0_5] : memref<32x1xf32, #tpu.memory_space<vmem>>, vector<32x1xf32>
    %5 = vector.broadcast %4 : vector<32x1xf32> to vector<32x16xf32>
    %6 = arith.mulf %3, %5 : vector<32x16xf32>
    %c0_6 = arith.constant 0 : index
    %c0_7 = arith.constant 0 : index
    %7 = vector.load %arg5[%c0_6, %c0_7] : memref<32x1xf32, #tpu.memory_space<vmem>>, vector<32x1xf32>
    %8 = vector.broadcast %7 : vector<32x1xf32> to vector<32x16xf32>
    %9 = arith.addf %6, %8 : vector<32x16xf32>
    %cst_8 = arith.constant 0.000000e+00 : f32
    %10 = vector.broadcast %cst_8 : f32 to vector<32x16xf32>
    %11 = arith.maximumf %9, %10 : vector<32x16xf32>
    %c0_9 = arith.constant 0 : index
    %c0_10 = arith.constant 0 : index
    %12 = vector.load %arg6[%c0_9, %c0_10] : memref<32x32xf32, #tpu.memory_space<vmem>>, vector<32x32xf32>
    %cst_11 = arith.constant dense<0.000000e+00> : vector<32x16xf32>
    %13 = tpu.matmul %12, %11, %cst_11 {dimension_numbers = #tpu.dot_dimension_numbers<[1], [0], [0], [1], [0, 0, 1, 1], [], []>} : vector<32x32xf32>, vector<32x16xf32>, vector<32x16xf32> -> vector<32x16xf32>
    %c0_12 = arith.constant 0 : index
    %c0_13 = arith.constant 0 : index
    %14 = vector.load %arg7[%c0_12, %c0_13] : memref<32x1xf32, #tpu.memory_space<vmem>>, vector<32x1xf32>
    %15 = vector.broadcast %14 : vector<32x1xf32> to vector<32x16xf32>
    %16 = arith.addf %13, %15 : vector<32x16xf32>
    %c0_14 = arith.constant 0 : index
    %c0_15 = arith.constant 0 : index
    %c0_16 = arith.constant 0 : index
    %17 = vector.load %arg8[%c0_14, %c0_15, %c0_16] : memref<1x32x16xf32, #tpu.memory_space<vmem>>, vector<1x32x16xf32>
    %18 = vector.shape_cast %17 : vector<1x32x16xf32> to vector<32x16xf32>
    %19 = vector.shape_cast %16 : vector<32x16xf32> to vector<1x32x16xf32>
    tpu.vector_store %arg8[%c0_14, %c0_15, %c0_16], %19 {strides = array<i32>} : memref<1x32x16xf32, #tpu.memory_space<vmem>>, vector<1x32x16xf32>,
    return
  }
  func.func @transform_0(%arg0: i32, %arg1: i32) -> (i32, i32, i32) {
    %c0_i32 = arith.constant 0 : i32
    %c0_i32_0 = arith.constant 0 : i32
    return %arg0, %arg1, %c0_i32 : i32, i32, i32
  }
  func.func @transform_1(%arg0: i32, %arg1: i32) -> (i32, i32) {
    %c0_i32 = arith.constant 0 : i32
    %c0_i32_0 = arith.constant 0 : i32
    %c0_i32_1 = arith.constant 0 : i32
    return %c0_i32, %c0_i32_0 : i32, i32
  }
  func.func @transform_2(%arg0: i32, %arg1: i32) -> (i32, i32) {
    %c0_i32 = arith.constant 0 : i32
    %c0_i32_0 = arith.constant 0 : i32
    %c0_i32_1 = arith.constant 0 : i32
    return %c0_i32, %c0_i32_0 : i32, i32
  }
  func.func @transform_3(%arg0: i32, %arg1: i32) -> (i32, i32) {
    %c0_i32 = arith.constant 0 : i32
    %c0_i32_0 = arith.constant 0 : i32
    %c0_i32_1 = arith.constant 0 : i32
    return %c0_i32, %c0_i32_0 : i32, i32
  }
  func.func @transform_4(%arg0: i32, %arg1: i32) -> (i32, i32) {
    %c0_i32 = arith.constant 0 : i32
    %c0_i32_0 = arith.constant 0 : i32
    %c0_i32_1 = arith.constant 0 : i32
    return %c0_i32, %c0_i32_0 : i32, i32
  }
  func.func @transform_5(%arg0: i32, %arg1: i32) -> (i32, i32) {
    %c0_i32 = arith.constant 0 : i32
    %c0_i32_0 = arith.constant 0 : i32
    %c0_i32_1 = arith.constant 0 : i32
    return %c0_i32, %c0_i32_0 : i32, i32
  }
  func.func @transform_6(%arg0: i32, %arg1: i32) -> (i32, i32, i32) {
    %c0_i32 = arith.constant 0 : i32
    %c0_i32_0 = arith.constant 0 : i32
    return %arg0, %c0_i32, %arg1 : i32, i32, i32
  }
}

</mosaic_0001>

<bundles_post_ra>
// kernel: tpu_custom_call.1
= control target key start
LH: loop header
LB: loop body
LE: loop exit
PB: predicated region body
PF: predicated region fallthrough
CT: control target
= control target key end

     0   :  { %s677_s21 = smov 0   ;;  %s679_s22 = smov 0   ;;  %s782_s0 = inlined_call_operand.vmem [shape: f32[2,16,4], index: 0, kind: input, shape index: {}]   ;;  %s783_s1 = inlined_call_operand.vmem [shape: f32[32,4], index: 1, kind: input, shape index: {}]   ;;  %s784_s2 = inlined_call_operand.vmem [shape: f32[32,1], index: 2, kind: input, shape index: {}]   ;;  %s785_s3 = inlined_call_operand.vmem [shape: f32[32,1], index: 3, kind: input, shape index: {}]   ;;  %s786_s4 = inlined_call_operand.vmem [shape: f32[32,32], index: 4, kind: input, shape index: {}]   ;;  %s787_s5 = inlined_call_operand.vmem [shape: f32[32,1], index: 5, kind: input, shape index: {}]   ;;  %s788_s6 = inlined_call_operand.vmem [shape: f32[2,32,16], index: 6, kind: output, shape index: {}]  }
   0x1   :  { %s681_s23 = smov 0  }
   0x2 LB: > { %s28_s24 = sadd.s32 1, %s635_s22  ;;  %p564_p0 = scmp.ge.s32.totalorder %s639_s23, 1  ;;  %s639_s23 = sphi %s681_s23, %s16_s23   ;;  %s635_s22 = sphi %s679_s22, %s790_s22   ;;  %s631_s21 = sphi %s677_s21, %s789_s21  }
   0x3   : > { %p30_p1 = scmp.ge.s32.totalorder %s28_s24, 2  ;;  %p233_p2 = scmp.lt.s32.totalorder %s639_s23, 3 }
   0x5   : > { %s792_s24 = smov (%p30_p1, %s28_s24), 0  ;;  %p234_p3 = pnand %p564_p0, %p233_p2 }
   0x6   : > { %p271_p4 = scmp.lt.s32.totalorder (!%p234_p3), %s631_s21, 1 }
   0x7   : > { %237 = sbr.rel (%p234_p3) target bundleno = 320 (0x140), region = 44 }
   0xc   : > { %v345_v0 = vld [vmem:[%s784_s2 + $0x18] sm:$0xff]  ;;  %v641_v2 = vmov 0   ;;  %s794_s21 = smov (!%p271_p4, %s631_s21), 1  ;;  %vm294_vm0 = vcmask 31744   ;;  %v372_v3 = vld [vmem:[%s785_s3 + $0x10] sm:$0xff]  ;;  %v343_v6 = vld [vmem:[%s784_s2 + $0x8] sm:$0xff] }
   0xd   : > { %v373_v1 = vld [vmem:[%s785_s3 + $0x18] sm:$0xff]  ;;  %614 = vset.pattern.permute.xlu0 %v641_v2  ;;  %615 = vset.pattern.permute.xlu1 %v641_v2  ;;  %s581_s29 = sshll.u32 %s794_s21, 4  ;;  %v344_v5 = vld [vmem:[%s784_s2 + $0x10] sm:$0xff]  ;;  %v342_v8 = vld [vmem:[%s784_s2] sm:$0xff]  ;;  %vm430_vm1 = vcmask 261120   ;;  %vm472_vm2 = vcmask 130048  }
   0xe   : > { %363 = vperm.xlu0 %614, %v345_v0   ;;  %391 = vperm.xlu1 %615, %v373_v1   ;;  %s278_s10 = scalar_lea.vmem %s782_s0, %s581_s29  ;;  %v290_v9 = vld [vmem:[%s783_s1] sm:$0xff]  ;;  %v292_v10 = vld [vmem:[%s783_s1 + $0x10] sm:$0xff]  ;;  %v371_v11 = vld [vmem:[%s785_s3 + $0x8] sm:$0xff]  ;;  %s582_s29 = sshll.u32 %s794_s21, 5 }
   0xf   : > { %616 = vset.pattern.permute.xlu2 %v641_v2  ;;  %v289_v4 = vld [vmem:[%s278_s10 + $0x8] sm:$0xff]  ;;  %v288_v7 = vld [vmem:[%s278_s10] sm:$0xff]  ;;  %v293_v15 = vld [vmem:[%s783_s1 + $0x18] sm:$0xff]  ;;  %s287_s8 = scalar_lea.vmem %s788_s6, %s582_s29 }
  0x10   : > { %386 = vperm.xlu2 %616, %v372_v3   ;;  %569 = vmatpush.xpose.msk.msra.mxu0 %vm294_vm0, %v289_v4  ;;  %v370_v12 = vld [vmem:[%s785_s3] sm:$0xff]  ;;  %v291_v14 = vld [vmem:[%s783_s1 + $0x8] sm:$0xff]  ;;  %v408_v17 = vld [vmem:[%s787_s5 + $0x10] sm:$0xff] }
  0x11   : > { %583 = vmatpush.xpose.msk.msra.mxu2 %vm294_vm0, %v289_v4  ;;  %v406_v13 = vld [vmem:[%s787_s5] sm:$0xff]  ;;  %v407_v16 = vld [vmem:[%s787_s5 + $0x8] sm:$0xff]  ;;  %v409_v18 = vld [vmem:[%s787_s5 + $0x18] sm:$0xff] }
  0x12   : > { %v402_v43 = vld [vmem:[%s786_s4] sm:$0xff]  ;;  %v404_v44 = vld [vmem:[%s786_s4 + $0x10] sm:$0xff]  ;;  %v403_v45 = vld [vmem:[%s786_s4 + $0x8] sm:$0xff] }
  0x13   : > { %v405_v46 = vld [vmem:[%s786_s4 + $0x18] sm:$0xff] }
  0x14   : > { %570 = vmatpush.xpose.msk.msra.mxu0 %vm294_vm0, %v288_v7 }
  0x15   : > { %584 = vmatpush.xpose.msk.msra.mxu2 %vm294_vm0, %v288_v7 }
  0x16   : > { %358 = vperm.xlu0 %614, %v344_v5   ;;  %353 = vperm.xlu1 %615, %v343_v6  }
  0x17   : > { %571 = vmatmul.msk.f32.vlgmr.msra.gmra.mxu0 %vm294_vm0, %v290_v9 }
  0x18   : > { %348 = vperm.xlu2 %616, %v342_v8   ;;  %573 = vmatmul.msk.f32.vlgmr.msra.gmra.mxu2 %vm294_vm0, %v292_v10 }
  0x1e   : > { %381 = vperm.xlu0 %614, %v371_v11   ;;  %376 = vperm.xlu1 %615, %v370_v12  }
  0x1f   : > { %572 = vmatmul.msk.f32.gmra.mxu0 %vm294_vm0, %v291_v14 }
  0x20   : > { %412 = vperm.xlu2 %616, %v406_v13   ;;  %574 = vmatmul.msk.f32.gmra.mxu2 %vm294_vm0, %v293_v15 }
  0x26   : > { %417 = vperm.xlu0 %614, %v407_v16   ;;  %422 = vperm.xlu1 %615, %v408_v17  }
  0x28   : > { %427 = vperm.xlu2 %616, %v409_v18  }
  0x6a   : > { %v387_v22 = vpop.permute.xlu2 %386 }
  0x72   : > { %v349_v31 = vpop.permute.xlu2 %348 }
  0x7a   : > { %v413_v47 = vpop.permute.xlu2 %412 }
  0x80   : > { %v364_v19 = vpop.permute.xlu0 %363  ;;  %v392_v20 = vpop.permute.xlu1 %391 }
  0x82   : > { %v428_v56 = vpop.permute.xlu2 %427 }
  0x88   : > { %v359_v24 = vpop.permute.xlu0 %358  ;;  %v354_v25 = vpop.permute.xlu1 %353 }
  0x90   : > { %v382_v35 = vpop.permute.xlu0 %381  ;;  %v377_v38 = vpop.permute.xlu1 %376 }
  0x94   : > { %v330_v21 = vpop.f32.mrf.mxu0 }
  0x95   : > { %v366_v32 = vmul.f32 %v349_v31, %v330_v21 }
  0x97   : > { %v394_v40 = vadd.f32 %v377_v38, %v366_v32 }
  0x98   : > { %v423_v50 = vpop.permute.xlu1 %422  ;;  %v418_v53 = vpop.permute.xlu0 %417 }
  0x99   : > { %v398_v42 = vmax.f32 %v394_v40, 0.0 }
  0x9b   : > { %v336_v23 = vpop.f32.mrf.mxu2 }
  0x9c   : > { %v333_v26 = vpop.f32.mrf.mxu0  ;;  %v368_v27 = vmul.f32 %v359_v24, %v336_v23 }
  0x9d   : > { %v367_v29 = vmul.f32 %v354_v25, %v333_v26 }
  0x9e   : > { %v396_v34 = vadd.f32 %v387_v22, %v368_v27 }
  0x9f   : > { %v395_v37 = vadd.f32 %v382_v35, %v367_v29 }
  0xa0   : > { %v400_v39 = vmax.f32 %v396_v34, 0.0 }
  0xa1   : > { %v399_v41 = vmax.f32 %v395_v37, 0.0 }
  0xa3   : > { %v339_v28 = vpop.f32.mrf.mxu2 }
  0xa4   : > { %v369_v30 = vmul.f32 %v364_v19, %v339_v28 }
  0xa6   : > { %v397_v33 = vadd.f32 %v392_v20, %v369_v30 }
  0xa8   : > { %v401_v36 = vmax.f32 %v397_v33, 0.0 }
  0xaa   : > { %455 = vmatpush.msra.mxu1 %v401_v36  ;;  %585 = vmatpush.msra.mxu3 %v401_v36 }
  0xac   : > { %456 = vmatpush.msra.mxu1 %v400_v39  ;;  %586 = vmatpush.msra.mxu3 %v400_v39 }
  0xae   : > { %457 = vmatpush.msra.mxu1 %v399_v41  ;;  %587 = vmatpush.msra.mxu3 %v399_v41 }
  0xb0   : > { %458 = vmatpush.msra.mxu1 %v398_v42  ;;  %588 = vmatpush.msra.mxu3 %v398_v42 }
  0xb1   : > { %575 = vmatmul.msk.f32.vlgmr.msra.gmra.mxu1 %vm430_vm1, %v402_v43  ;;  %577 = vmatmul.msk.f32.vlgmr.msra.gmra.mxu3 %vm430_vm1, %v404_v44 }
  0xb9   : > { %576 = vmatmul.msk.f32.gmra.mxu1 %vm430_vm1, %v403_v45  ;;  %578 = vmatmul.msk.f32.gmra.mxu3 %vm430_vm1, %v405_v46 }
 0x12e   : > { %v460_v48 = vpop.f32.mrf.mxu1 }
 0x12f   : > { %v461_v49 = vadd.f32 %v460_v48, %v413_v47 }
 0x131   : > { %473 = vst.msk [vmem:[%s287_s8] sm:$0xff] %vm472_vm2, %v461_v49 }
 0x134   : > { %v466_v51 = vpop.f32.mrf.mxu3 }
 0x135   : > { %v467_v52 = vadd.f32 %v466_v51, %v423_v50 }
 0x136   : > { %v463_v54 = vpop.f32.mrf.mxu1 }
 0x137   : > { %475 = vst.msk [vmem:[%s287_s8 + $0x10] sm:$0xff] %vm472_vm2, %v467_v52  ;;  %v464_v55 = vadd.f32 %v463_v54, %v418_v53 }
 0x139   : > { %474 = vst.msk [vmem:[%s287_s8 + $0x8] sm:$0xff] %vm472_vm2, %v464_v55 }
 0x13c   : > { %v469_v57 = vpop.f32.mrf.mxu3 }
 0x13d   : > { %v470_v58 = vadd.f32 %v469_v57, %v428_v56 }
 0x13f   : > { %476 = vst.msk [vmem:[%s287_s8 + $0x18] sm:$0xff] %vm472_vm2, %v470_v58 }
 0x140 PF: > { %s16_s23 = sadd.s32 1, %s639_s23   ;;  %s789_s21 = smov %s635_s22 }
 0x141   : > { %p13_p5 = scmp.ge.s32.totalorder %s16_s23, 4   ;;  %s790_s22 = smov %s792_s24 }
 0x143   :  { %15 = sbr.rel (!%p13_p5) target bundleno = 2 (0x2), region = 74 }

</bundles_post_ra>
